<compile_context>
chip_gen: v7x
topology: tpu7x:2x2x1
jax: 0.10.0
libtpu: 0.0.40
codegen_flags: <defaults>
</compile_context>

<pallas_src>
import functools

import jax
import jax.numpy as jnp
from jax.experimental import pallas as pl
from jax.experimental.pallas import tpu as pltpu


def _round_up(n, m):
    return ((n + m - 1) // m) * m


def _act_dtype_for_backend():
    """bf16 elementwise on v6e/v7x (bf16-native VPU); f32 on v5e (no bf16 VALU)."""
    try:
        kind = jax.devices()[0].device_kind.lower()
    except Exception:
        return jnp.bfloat16
    if "v5 lite" in kind or "v5e" in kind or "v5litepod" in kind:
        return jnp.float32
    return jnp.bfloat16


def _qnetwork_kernel(x_ref,
                     w1_ref, b1_ref,
                     w2_ref, b2_ref,
                     w3_ref, b3_ref,
                     w4_ref, b4_ref,
                     out_ref, *, act_dtype):
    """Fused 4-layer MLP on one feature-major batch tile.

    Feature-major layout: batch is the minor (lane) dim, weights are (out, in).
      x  : (S,   TB) bf16      out: (A, TB) f32
      wN : (outN, inN) bf16    bN : (outN, 1) f32
    Each layer is  W @ h + b  (== PyTorch  h @ W.T + b  in the transposed view).
    """
    def layer(h, w_ref, b_ref, relu):
        o = jnp.dot(w_ref[...], h, preferred_element_type=jnp.float32) + b_ref[...]
        if relu:
            o = jnp.maximum(o.astype(act_dtype), 0)   # ReLU in bf16 where the VPU has it
            o = o.astype(jnp.bfloat16)                 # MXU input dtype for next layer
        return o

    h = layer(x_ref[...], w1_ref, b1_ref, relu=True)
    h = layer(h, w2_ref, b2_ref, relu=True)
    h = layer(h, w3_ref, b3_ref, relu=True)
    out_ref[...] = layer(h, w4_ref, b4_ref, relu=False).astype(out_ref.dtype)


def _pick_tile(Bp, tb, tb_cap):
    """Batch-lane tile: multiple of 128; >=2 grid steps when the batch allows it."""
    if tb is not None:
        return min(_round_up(max(tb, 128), 128), Bp)
    if Bp <= 128:
        return Bp
    n_steps = max(2, pl.cdiv(Bp, tb_cap))   # >=2: megacore sharding + pipeline overlap
    return min(_round_up(pl.cdiv(Bp, n_steps), 128), Bp)


@functools.partial(jax.jit, static_argnames=("tb", "tb_cap"))
def qnetwork_forward(x, params, *, tb=None, tb_cap=8192):
    """QNetwork forward. x:(B, state_size) f32 -> (B, action_size) f32."""
    B, S = x.shape
    F1, F2, F3 = params["w1"].shape[0], params["w2"].shape[0], params["w3"].shape[0]
    A = params["w4"].shape[0]

    act_dtype = _act_dtype_for_backend()

    # Pad the batch only to the 128-lane boundary (not to a tile multiple) and go
    # feature-major: batch in the lane dim -> lane-dense loads/stores, tiny x/out tiles.
    Bp = _round_up(B, 128)
    x_t = x.T.astype(jnp.bfloat16)                  # (S, B), bf16 MXU input (one fused op)
    if Bp != B:
        x_t = jnp.pad(x_t, ((0, 0), (0, Bp - B)))

    tbp = _pick_tile(Bp, tb, tb_cap)
    grid = (pl.cdiv(Bp, tbp),)                      # ragged last tile handled by Pallas

    def resident(arr):
        # Whole-array block, same block index every step -> DMA'd once, VMEM-resident.
        return pl.BlockSpec(arr.shape, lambda i: (0, 0))

    w1, w2, w3, w4 = params["w1"], params["w2"], params["w3"], params["w4"]
    b1, b2, b3, b4 = params["b1"], params["b2"], params["b3"], params["b4"]

    flops = 2 * Bp * (S * F1 + F1 * F2 + F2 * F3 + F3 * A)
    bytes_accessed = (
        x_t.size * x_t.dtype.itemsize + Bp * A * 4
        + sum(w.size * w.dtype.itemsize for w in (w1, w2, w3, w4))
        + sum(b.size * 4 for b in (b1, b2, b3, b4)))

    out_t = pl.pallas_call(
        functools.partial(_qnetwork_kernel, act_dtype=act_dtype),
        out_shape=jax.ShapeDtypeStruct((A, Bp), jnp.float32),
        grid=grid,
        in_specs=[
            # x streamed over batch lanes. (pipeline_mode=pl.Buffered(3) is an option
            # if profiling still shows the first tile's DMA exposed.)
            pl.BlockSpec((S, tbp), lambda i: (0, i)),
            resident(w1), resident(b1),
            resident(w2), resident(b2),
            resident(w3), resident(b3),
            resident(w4), resident(b4),
        ],
        out_specs=pl.BlockSpec((A, tbp), lambda i: (0, i)),
        compiler_params=pltpu.CompilerParams(
            dimension_semantics=("parallel",),
            vmem_limit_bytes=48 * 1024 * 1024),      # explicit; safe on v5e/v6e/v7x
        cost_estimate=pl.CostEstimate(
            flops=flops, bytes_accessed=bytes_accessed, transcendentals=0),
    )(x_t, w1, b1, w2, b2, w3, b3, w4, b4)

    return out_t.T if Bp == B else out_t[:, :B].T


def init_qnetwork_params(key, state_size, action_size, fc_units=64):
    """PyTorch nn.Linear-style init (U[-1/sqrt(fan_in), 1/sqrt(fan_in)]).

    Weights stored (out, in) in bf16 (cast once here, not per forward call);
    biases stored (out, 1) in f32.
    """
    dims = [(fc_units, state_size),
            (fc_units * 2, fc_units),
            (fc_units * 4, fc_units * 2),
            (action_size, fc_units * 4)]
    params = {}
    for i, (fan_out, fan_in) in enumerate(dims, start=1):
        key, kw, kb = jax.random.split(key, 3)
        bound = 1.0 / float(fan_in) ** 0.5
        w = jax.random.uniform(kw, (fan_out, fan_in), jnp.float32, minval=-bound, maxval=bound)
        b = jax.random.uniform(kb, (fan_out, 1), jnp.float32, minval=-bound, maxval=bound)
        params[f"w{i}"] = w.astype(jnp.bfloat16)
        params[f"b{i}"] = b
    return params


def qnetwork_reference(x, params):
    """Pure-JAX reference of the same forward pass (weights upcast from bf16)."""
    h = x
    for i in range(1, 5):
        w = params[f"w{i}"].astype(jnp.float32)
        b = params[f"b{i}"][:, 0]
        h = h @ w.T + b
        if i < 4:
            h = jax.nn.relu(h)
    return h


if __name__ == "__main__":
    key = jax.random.PRNGKey(0)
    state_size, action_size, fc_units = 8, 4, 64

    kp, kx, kx2 = jax.random.split(key, 3)
    params = init_qnetwork_params(kp, state_size, action_size, fc_units)

    # Act-selection path: tiny batch, single 128-lane tile.
    x = jax.random.normal(kx, (2, state_size), jnp.float32)
    out = jax.block_until_ready(qnetwork_forward(x, params))
    ref = qnetwork_reference(x, params)
    assert out.shape == (2, action_size)
    assert jnp.allclose(out, ref, atol=5e-2, rtol=5e-2), "mismatch vs reference (small batch)"

    # Learning path: ragged batch -> 128-padded, multi-step pipelined grid.
    x2 = jax.random.normal(kx2, (300, state_size), jnp.float32)
    out2 = jax.block_until_ready(qnetwork_forward(x2, params))
    ref2 = qnetwork_reference(x2, params)
    assert out2.shape == (300, action_size)
    assert jnp.allclose(out2, ref2, atol=5e-2, rtol=5e-2), "mismatch vs reference (tiled batch)"

    print("KERNEL_OK")
</pallas_src>

<mosaic_0001>
module attributes {stable_mosaic.version = 11 : i64} {
  func.func @_qnetwork_kernel(%arg0: i32, %arg1: memref<8x128xbf16, #tpu.memory_space<vmem>>, %arg2: memref<64x8xbf16, #tpu.memory_space<vmem>>, %arg3: memref<64x1xf32, #tpu.memory_space<vmem>>, %arg4: memref<128x64xbf16, #tpu.memory_space<vmem>>, %arg5: memref<128x1xf32, #tpu.memory_space<vmem>>, %arg6: memref<256x128xbf16, #tpu.memory_space<vmem>>, %arg7: memref<256x1xf32, #tpu.memory_space<vmem>>, %arg8: memref<4x256xbf16, #tpu.memory_space<vmem>>, %arg9: memref<4x1xf32, #tpu.memory_space<vmem>>, %arg10: memref<4x128xf32, #tpu.memory_space<vmem>>) attributes {dimension_semantics = [#tpu.dimension_semantics<parallel>], iteration_bounds = array<i64: 1>, scalar_prefetch = 0 : i64, scratch_operands = 0 : i64, tpu.core_type = #tpu.core_type<tc>, window_params = [{transform_indices = @transform_0, window_bounds = array<i64: 8, 128>}, {pipeline_mode = #tpu.pipeline_mode<synchronous>, transform_indices = @transform_1, window_bounds = array<i64: 64, 8>}, {pipeline_mode = #tpu.pipeline_mode<synchronous>, transform_indices = @transform_2, window_bounds = array<i64: 64, 1>}, {pipeline_mode = #tpu.pipeline_mode<synchronous>, transform_indices = @transform_3, window_bounds = array<i64: 128, 64>}, {pipeline_mode = #tpu.pipeline_mode<synchronous>, transform_indices = @transform_4, window_bounds = array<i64: 128, 1>}, {pipeline_mode = #tpu.pipeline_mode<synchronous>, transform_indices = @transform_5, window_bounds = array<i64: 256, 128>}, {pipeline_mode = #tpu.pipeline_mode<synchronous>, transform_indices = @transform_6, window_bounds = array<i64: 256, 1>}, {pipeline_mode = #tpu.pipeline_mode<synchronous>, transform_indices = @transform_7, window_bounds = array<i64: 4, 256>}, {pipeline_mode = #tpu.pipeline_mode<synchronous>, transform_indices = @transform_8, window_bounds = array<i64: 4, 1>}, {transform_indices = @transform_9, window_bounds = array<i64: 4, 128>}]} {
    %c0 = arith.constant 0 : index
    %c0_0 = arith.constant 0 : index
    %0 = vector.load %arg1[%c0, %c0_0] : memref<8x128xbf16, #tpu.memory_space<vmem>>, vector<8x128xbf16>
    %c0_1 = arith.constant 0 : index
    %c0_2 = arith.constant 0 : index
    %1 = vector.load %arg2[%c0_1, %c0_2] : memref<64x8xbf16, #tpu.memory_space<vmem>>, vector<64x8xbf16>
    %cst = arith.constant dense<0.000000e+00> : vector<64x128xf32>
    %2 = tpu.matmul %1, %0, %cst {dimension_numbers = #tpu.dot_dimension_numbers<[1], [0], [0], [1], [0, 0, 1, 1], [], []>} : vector<64x8xbf16>, vector<8x128xbf16>, vector<64x128xf32> -> vector<64x128xf32>
    %c0_3 = arith.constant 0 : index
    %c0_4 = arith.constant 0 : index
    %3 = vector.load %arg3[%c0_3, %c0_4] : memref<64x1xf32, #tpu.memory_space<vmem>>, vector<64x1xf32>
    %4 = vector.broadcast %3 : vector<64x1xf32> to vector<64x128xf32>
    %5 = arith.addf %2, %4 : vector<64x128xf32>
    %6 = arith.truncf %5 : vector<64x128xf32> to vector<64x128xbf16>
    %cst_5 = arith.constant 0.000000e+00 : bf16
    %7 = vector.broadcast %cst_5 : bf16 to vector<64x128xbf16>
    %8 = arith.maximumf %6, %7 : vector<64x128xbf16>
    %c0_6 = arith.constant 0 : index
    %c0_7 = arith.constant 0 : index
    %9 = vector.load %arg4[%c0_6, %c0_7] : memref<128x64xbf16, #tpu.memory_space<vmem>>, vector<128x64xbf16>
    %cst_8 = arith.constant dense<0.000000e+00> : vector<128x128xf32>
    %10 = tpu.matmul %9, %8, %cst_8 {dimension_numbers = #tpu.dot_dimension_numbers<[1], [0], [0], [1], [0, 0, 1, 1], [], []>} : vector<128x64xbf16>, vector<64x128xbf16>, vector<128x128xf32> -> vector<128x128xf32>
    %c0_9 = arith.constant 0 : index
    %c0_10 = arith.constant 0 : index
    %11 = vector.load %arg5[%c0_9, %c0_10] : memref<128x1xf32, #tpu.memory_space<vmem>>, vector<128x1xf32>
    %12 = vector.broadcast %11 : vector<128x1xf32> to vector<128x128xf32>
    %13 = arith.addf %10, %12 : vector<128x128xf32>
    %14 = arith.truncf %13 : vector<128x128xf32> to vector<128x128xbf16>
    %cst_11 = arith.constant 0.000000e+00 : bf16
    %15 = vector.broadcast %cst_11 : bf16 to vector<128x128xbf16>
    %16 = arith.maximumf %14, %15 : vector<128x128xbf16>
    %c0_12 = arith.constant 0 : index
    %c0_13 = arith.constant 0 : index
    %17 = vector.load %arg6[%c0_12, %c0_13] : memref<256x128xbf16, #tpu.memory_space<vmem>>, vector<256x128xbf16>
    %cst_14 = arith.constant dense<0.000000e+00> : vector<256x128xf32>
    %18 = tpu.matmul %17, %16, %cst_14 {dimension_numbers = #tpu.dot_dimension_numbers<[1], [0], [0], [1], [0, 0, 1, 1], [], []>} : vector<256x128xbf16>, vector<128x128xbf16>, vector<256x128xf32> -> vector<256x128xf32>
    %c0_15 = arith.constant 0 : index
    %c0_16 = arith.constant 0 : index
    %19 = vector.load %arg7[%c0_15, %c0_16] : memref<256x1xf32, #tpu.memory_space<vmem>>, vector<256x1xf32>
    %20 = vector.broadcast %19 : vector<256x1xf32> to vector<256x128xf32>
    %21 = arith.addf %18, %20 : vector<256x128xf32>
    %22 = arith.truncf %21 : vector<256x128xf32> to vector<256x128xbf16>
    %cst_17 = arith.constant 0.000000e+00 : bf16
    %23 = vector.broadcast %cst_17 : bf16 to vector<256x128xbf16>
    %24 = arith.maximumf %22, %23 : vector<256x128xbf16>
    %c0_18 = arith.constant 0 : index
    %c0_19 = arith.constant 0 : index
    %25 = vector.load %arg8[%c0_18, %c0_19] : memref<4x256xbf16, #tpu.memory_space<vmem>>, vector<4x256xbf16>
    %cst_20 = arith.constant dense<0.000000e+00> : vector<4x128xf32>
    %26 = tpu.matmul %25, %24, %cst_20 {dimension_numbers = #tpu.dot_dimension_numbers<[1], [0], [0], [1], [0, 0, 1, 1], [], []>} : vector<4x256xbf16>, vector<256x128xbf16>, vector<4x128xf32> -> vector<4x128xf32>
    %c0_21 = arith.constant 0 : index
    %c0_22 = arith.constant 0 : index
    %27 = vector.load %arg9[%c0_21, %c0_22] : memref<4x1xf32, #tpu.memory_space<vmem>>, vector<4x1xf32>
    %28 = vector.broadcast %27 : vector<4x1xf32> to vector<4x128xf32>
    %29 = arith.addf %26, %28 : vector<4x128xf32>
    %c0_23 = arith.constant 0 : index
    %c0_24 = arith.constant 0 : index
    %30 = vector.load %arg10[%c0_23, %c0_24] : memref<4x128xf32, #tpu.memory_space<vmem>>, vector<4x128xf32>
    tpu.vector_store %arg10[%c0_23, %c0_24], %29 {strides = array<i32>} : memref<4x128xf32, #tpu.memory_space<vmem>>, vector<4x128xf32>,
    return
  }
  func.func @transform_0(%arg0: i32) -> (i32, i32) {
    %c0_i32 = arith.constant 0 : i32
    %c0_i32_0 = arith.constant 0 : i32
    return %c0_i32, %arg0 : i32, i32
  }
  func.func @transform_1(%arg0: i32) -> (i32, i32) {
    %c0_i32 = arith.constant 0 : i32
    %c0_i32_0 = arith.constant 0 : i32
    %c0_i32_1 = arith.constant 0 : i32
    return %c0_i32, %c0_i32_0 : i32, i32
  }
  func.func @transform_2(%arg0: i32) -> (i32, i32) {
    %c0_i32 = arith.constant 0 : i32
    %c0_i32_0 = arith.constant 0 : i32
    %c0_i32_1 = arith.constant 0 : i32
    return %c0_i32, %c0_i32_0 : i32, i32
  }
  func.func @transform_3(%arg0: i32) -> (i32, i32) {
    %c0_i32 = arith.constant 0 : i32
    %c0_i32_0 = arith.constant 0 : i32
    %c0_i32_1 = arith.constant 0 : i32
    return %c0_i32, %c0_i32_0 : i32, i32
  }
  func.func @transform_4(%arg0: i32) -> (i32, i32) {
    %c0_i32 = arith.constant 0 : i32
    %c0_i32_0 = arith.constant 0 : i32
    %c0_i32_1 = arith.constant 0 : i32
    return %c0_i32, %c0_i32_0 : i32, i32
  }
  func.func @transform_5(%arg0: i32) -> (i32, i32) {
    %c0_i32 = arith.constant 0 : i32
    %c0_i32_0 = arith.constant 0 : i32
    %c0_i32_1 = arith.constant 0 : i32
    return %c0_i32, %c0_i32_0 : i32, i32
  }
  func.func @transform_6(%arg0: i32) -> (i32, i32) {
    %c0_i32 = arith.constant 0 : i32
    %c0_i32_0 = arith.constant 0 : i32
    %c0_i32_1 = arith.constant 0 : i32
    return %c0_i32, %c0_i32_0 : i32, i32
  }
  func.func @transform_7(%arg0: i32) -> (i32, i32) {
    %c0_i32 = arith.constant 0 : i32
    %c0_i32_0 = arith.constant 0 : i32
    %c0_i32_1 = arith.constant 0 : i32
    return %c0_i32, %c0_i32_0 : i32, i32
  }
  func.func @transform_8(%arg0: i32) -> (i32, i32) {
    %c0_i32 = arith.constant 0 : i32
    %c0_i32_0 = arith.constant 0 : i32
    %c0_i32_1 = arith.constant 0 : i32
    return %c0_i32, %c0_i32_0 : i32, i32
  }
  func.func @transform_9(%arg0: i32) -> (i32, i32) {
    %c0_i32 = arith.constant 0 : i32
    %c0_i32_0 = arith.constant 0 : i32
    return %c0_i32, %arg0 : i32, i32
  }
}

</mosaic_0001>

<bundles_post_ra>
// kernel: qnetwork_forward.1
= control target key start
LH: loop header
LB: loop body
LE: loop exit
PB: predicated region body
PF: predicated region fallthrough
CT: control target
= control target key end

     0   :  { %vm123_vm0 = vcmask 1043456   ;;  %v1284_v0 = vmov 0   ;;  %vm110_vm1 = vcmask 64512   ;;  %vm352_vm2 = vcmask 523264   ;;  %s1745_s2 = inlined_call_operand.vmem [shape: f32[64,1], index: 2, kind: input, shape index: {}]   ;;  %s1746_s0 = inlined_call_operand.vmem [shape: bf16[8,128], index: 0, kind: input, shape index: {}]   ;;  %s1747_s1 = inlined_call_operand.vmem [shape: bf16[64,8], index: 1, kind: input, shape index: {}]   ;;  %s1748_s4 = inlined_call_operand.vmem [shape: f32[128,1], index: 4, kind: input, shape index: {}]   ;;  %s1749_s6 = inlined_call_operand.vmem [shape: f32[256,1], index: 6, kind: input, shape index: {}]   ;;  %s1750_s8 = inlined_call_operand.vmem [shape: f32[4,1], index: 8, kind: input, shape index: {}]   ;;  %s1751_s3 = inlined_call_operand.vmem [shape: bf16[128,64], index: 3, kind: input, shape index: {}]   ;;  %s1752_s5 = inlined_call_operand.vmem [shape: bf16[256,128], index: 5, kind: input, shape index: {}]   ;;  %s1753_s7 = inlined_call_operand.vmem [shape: bf16[4,256], index: 7, kind: input, shape index: {}]   ;;  %s1754_s9 = inlined_call_operand.vmem [shape: f32[4,128], index: 9, kind: output, shape index: {}]  }
   0x1   :  { %1255 = vset.pattern.permute.xlu1 %v1284_v0  ;;  %1254 = vset.pattern.permute.xlu0 %v1284_v0  ;;  %v44_v1 = vld [vmem:[%s1745_s2 + $0x10] sm:$0xff]  ;;  %v42_v2 = vld [vmem:[%s1745_s2] sm:$0xff]  ;;  %v45_v6 = vld [vmem:[%s1745_s2 + $0x18] sm:$0xff] }
   0x2   :  { %v33_v3 = vld [vmem:[%s1746_s0] sm:$0xf]  ;;  %62 = vperm.xlu1 %1255, %v44_v1   ;;  %52 = vperm.xlu0 %1254, %v42_v2   ;;  %v43_v7 = vld [vmem:[%s1745_s2 + $0x8] sm:$0xff]  ;;  %v1258_v10 = vld [vmem:[%s1747_s1 + $0x10] sm:$0xff]  }
   0x3   :  { %v125_v4 = vsel %vm123_vm0, %v33_v3, 0  ;;  %v1256_v5 = vld [vmem:[%s1747_s1] sm:$0xff]   ;;  %1252 = vmatprep.subr.msk.bf16.mxu1 %vm123_vm0, %v33_v3  ;;  %v1257_v8 = vld [vmem:[%s1747_s1 + $0x8] sm:$0xff]   ;;  %v49_v12 = vld [vmem:[%s1745_s2 + $0x38] sm:$0xff] }
   0x4   :  { %1171 = vmatpush3.bf16.msra.mxu1 %v125_v4  ;;  %1172 = vmatprep.mubr.msk.bf16.mxu1 %vm110_vm1, %v1256_v5  ;;  %v47_v9 = vld [vmem:[%s1745_s2 + $0x28] sm:$0xff]  ;;  %v46_v11 = vld [vmem:[%s1745_s2 + $0x20] sm:$0xff]  ;;  %v48_v13 = vld [vmem:[%s1745_s2 + $0x30] sm:$0xff] }
   0x5   :  { %v1259_v14 = vld [vmem:[%s1747_s1 + $0x18] sm:$0xff]   ;;  %v217_v15 = vld [vmem:[%s1748_s4 + $0x8] sm:$0xff]  ;;  %v216_v16 = vld [vmem:[%s1748_s4] sm:$0xff] }
   0x6   :  { %67 = vperm.xlu1 %1255, %v45_v6   ;;  %57 = vperm.xlu0 %1254, %v43_v7   ;;  %v219_v17 = vld [vmem:[%s1748_s4 + $0x18] sm:$0xff]  ;;  %v218_v18 = vld [vmem:[%s1748_s4 + $0x10] sm:$0xff]  ;;  %v221_v19 = vld [vmem:[%s1748_s4 + $0x28] sm:$0xff] }
   0x7   :  { %1173 = vmatmul.mubr.msk.bf16.vlgmr.msra.gmra.mrb[0].mxu1 %vm110_vm1, %v1257_v8  ;;  %v220_v20 = vld [vmem:[%s1748_s4 + $0x20] sm:$0xff]  ;;  %v223_v21 = vld [vmem:[%s1748_s4 + $0x38] sm:$0xff]  ;;  %v222_v22 = vld [vmem:[%s1748_s4 + $0x30] sm:$0xff] }
   0x8   :  { %1176 = vmatprep.mubr.msk.bf16.mxu1 %vm110_vm1, %v1258_v10  ;;  %v225_v23 = vld [vmem:[%s1748_s4 + $0x48] sm:$0xff]  ;;  %v224_v24 = vld [vmem:[%s1748_s4 + $0x40] sm:$0xff]  ;;  %v227_v25 = vld [vmem:[%s1748_s4 + $0x58] sm:$0xff] }
   0x9   :  { %v226_v26 = vld [vmem:[%s1748_s4 + $0x50] sm:$0xff]  ;;  %v229_v27 = vld [vmem:[%s1748_s4 + $0x68] sm:$0xff]  ;;  %v228_v28 = vld [vmem:[%s1748_s4 + $0x60] sm:$0xff] }
   0xa   :  { %77 = vperm.xlu1 %1255, %v47_v9   ;;  %72 = vperm.xlu0 %1254, %v46_v11   ;;  %v231_v29 = vld [vmem:[%s1748_s4 + $0x78] sm:$0xff]  ;;  %v230_v30 = vld [vmem:[%s1748_s4 + $0x70] sm:$0xff]  ;;  %v539_v31 = vld [vmem:[%s1749_s6 + $0x88] sm:$0xff] }
   0xb   :  { %v538_v32 = vld [vmem:[%s1749_s6 + $0x80] sm:$0xff]  ;;  %v523_v33 = vld [vmem:[%s1749_s6 + $0x8] sm:$0xff]  ;;  %v541_v35 = vld [vmem:[%s1749_s6 + $0x98] sm:$0xff] }
   0xc   :  { %v522_v34 = vld [vmem:[%s1749_s6] sm:$0xff]  ;;  %v540_v36 = vld [vmem:[%s1749_s6 + $0x90] sm:$0xff]  ;;  %v525_v37 = vld [vmem:[%s1749_s6 + $0x18] sm:$0xff] }
   0xd   :  { %v524_v38 = vld [vmem:[%s1749_s6 + $0x10] sm:$0xff]  ;;  %v543_v39 = vld [vmem:[%s1749_s6 + $0xa8] sm:$0xff]  ;;  %v542_v40 = vld [vmem:[%s1749_s6 + $0xa0] sm:$0xff] }
   0xe   :  { %87 = vperm.xlu1 %1255, %v49_v12   ;;  %82 = vperm.xlu0 %1254, %v48_v13   ;;  %v527_v41 = vld [vmem:[%s1749_s6 + $0x28] sm:$0xff]  ;;  %v526_v42 = vld [vmem:[%s1749_s6 + $0x20] sm:$0xff]  ;;  %v545_v43 = vld [vmem:[%s1749_s6 + $0xb8] sm:$0xff] }
   0xf   :  { %1177 = vmatmul.mubr.msk.bf16.gmra.mrb[4].mxu1 %vm110_vm1, %v1259_v14  ;;  %v544_v44 = vld [vmem:[%s1749_s6 + $0xb0] sm:$0xff]  ;;  %v529_v45 = vld [vmem:[%s1749_s6 + $0x38] sm:$0xff]  ;;  %v547_v47 = vld [vmem:[%s1749_s6 + $0xc8] sm:$0xff] }
  0x10   :  { %v528_v46 = vld [vmem:[%s1749_s6 + $0x30] sm:$0xff]  ;;  %v546_v48 = vld [vmem:[%s1749_s6 + $0xc0] sm:$0xff]  ;;  %v531_v49 = vld [vmem:[%s1749_s6 + $0x48] sm:$0xff] }
  0x11   :  { %v530_v50 = vld [vmem:[%s1749_s6 + $0x40] sm:$0xff]  ;;  %v549_v51 = vld [vmem:[%s1749_s6 + $0xd8] sm:$0xff]  ;;  %v548_v52 = vld [vmem:[%s1749_s6 + $0xd0] sm:$0xff] }
  0x12   :  { %239 = vperm.xlu1 %1255, %v217_v15   ;;  %234 = vperm.xlu0 %1254, %v216_v16   ;;  %v533_v53 = vld [vmem:[%s1749_s6 + $0x58] sm:$0xff]  ;;  %v532_v54 = vld [vmem:[%s1749_s6 + $0x50] sm:$0xff]  ;;  %v551_v55 = vld [vmem:[%s1749_s6 + $0xe8] sm:$0xff] }
  0x13   :  { %v550_v56 = vld [vmem:[%s1749_s6 + $0xe0] sm:$0xff]  ;;  %v535_v57 = vld [vmem:[%s1749_s6 + $0x68] sm:$0xff]  ;;  %v553_v59 = vld [vmem:[%s1749_s6 + $0xf8] sm:$0xff] }
  0x14   :  { %v534_v58 = vld [vmem:[%s1749_s6 + $0x60] sm:$0xff]  ;;  %v552_v60 = vld [vmem:[%s1749_s6 + $0xf0] sm:$0xff]  ;;  %v537_v61 = vld [vmem:[%s1749_s6 + $0x78] sm:$0xff] }
  0x15   :  { %v536_v62 = vld [vmem:[%s1749_s6 + $0x70] sm:$0xff]  ;;  %v1004_v63 = vld [vmem:[%s1750_s8] sm:$0xf] }
  0x16   :  { %249 = vperm.xlu1 %1255, %v219_v17   ;;  %244 = vperm.xlu0 %1254, %v218_v18   ;;  %v1260_v1 = vld [vmem:[%s1751_s3] sm:$0xff]  }
  0x17   :  { %1188 = vmatprep.mubr.msk.bf16.mxu1 %vm352_vm2, %v1260_v1 }
  0x1a   :  { %259 = vperm.xlu1 %1255, %v221_v19   ;;  %254 = vperm.xlu0 %1254, %v220_v20  }
  0x1e   :  { %269 = vperm.xlu1 %1255, %v223_v21   ;;  %264 = vperm.xlu0 %1254, %v222_v22  }
  0x22   :  { %279 = vperm.xlu1 %1255, %v225_v23   ;;  %274 = vperm.xlu0 %1254, %v224_v24  }
  0x26   :  { %289 = vperm.xlu1 %1255, %v227_v25   ;;  %284 = vperm.xlu0 %1254, %v226_v26  }
  0x2a   :  { %299 = vperm.xlu1 %1255, %v229_v27   ;;  %294 = vperm.xlu0 %1254, %v228_v28  }
  0x2e   :  { %309 = vperm.xlu1 %1255, %v231_v29   ;;  %304 = vperm.xlu0 %1254, %v230_v30  }
  0x32   :  { %641 = vperm.xlu1 %1255, %v539_v31   ;;  %636 = vperm.xlu0 %1254, %v538_v32  }
  0x36   :  { %561 = vperm.xlu1 %1255, %v523_v33   ;;  %556 = vperm.xlu0 %1254, %v522_v34   ;;  %v1261_v34 = vld [vmem:[%s1751_s3 + $0x8] sm:$0xff]  }
  0x3a   :  { %651 = vperm.xlu1 %1255, %v541_v35   ;;  %646 = vperm.xlu0 %1254, %v540_v36   ;;  %v1262_v35 = vld [vmem:[%s1751_s3 + $0x10] sm:$0xff]   ;;  %v1263_v36 = vld [vmem:[%s1751_s3 + $0x18] sm:$0xff]  }
  0x3e   :  { %571 = vperm.xlu1 %1255, %v525_v37   ;;  %566 = vperm.xlu0 %1254, %v524_v38   ;;  %v1264_v37 = vld [vmem:[%s1751_s3 + $0x20] sm:$0xff]   ;;  %v1265_v38 = vld [vmem:[%s1751_s3 + $0x28] sm:$0xff]  }
  0x42   :  { %661 = vperm.xlu1 %1255, %v543_v39   ;;  %656 = vperm.xlu0 %1254, %v542_v40   ;;  %v1266_v39 = vld [vmem:[%s1751_s3 + $0x30] sm:$0xff]   ;;  %v1267_v40 = vld [vmem:[%s1751_s3 + $0x38] sm:$0xff]  }
  0x46   :  { %581 = vperm.xlu1 %1255, %v527_v41   ;;  %576 = vperm.xlu0 %1254, %v526_v42   ;;  %v1268_v41 = vld [vmem:[%s1752_s5] sm:$0xff]  }
  0x47   :  { %1220 = vmatprep.mubr.bf16.mxu0 %v1268_v41 }
  0x4a   :  { %671 = vperm.xlu1 %1255, %v545_v43   ;;  %666 = vperm.xlu0 %1254, %v544_v44  }
  0x4e   :  { %591 = vperm.xlu1 %1255, %v529_v45   ;;  %586 = vperm.xlu0 %1254, %v528_v46  }
  0x52   :  { %681 = vperm.xlu1 %1255, %v547_v47   ;;  %676 = vperm.xlu0 %1254, %v546_v48  }
  0x56   :  { %601 = vperm.xlu1 %1255, %v531_v49   ;;  %596 = vperm.xlu0 %1254, %v530_v50  }
  0x5a   :  { %691 = vperm.xlu1 %1255, %v549_v51   ;;  %686 = vperm.xlu0 %1254, %v548_v52  }
  0x5e   :  { %611 = vperm.xlu1 %1255, %v533_v53   ;;  %606 = vperm.xlu0 %1254, %v532_v54  }
  0x62   :  { %701 = vperm.xlu1 %1255, %v551_v55   ;;  %696 = vperm.xlu0 %1254, %v550_v56  }
  0x66   :  { %621 = vperm.xlu1 %1255, %v535_v57   ;;  %616 = vperm.xlu0 %1254, %v534_v58  }
  0x6a   :  { %711 = vperm.xlu1 %1255, %v553_v59   ;;  %706 = vperm.xlu0 %1254, %v552_v60  }
  0x6e   :  { %631 = vperm.xlu1 %1255, %v537_v61   ;;  %626 = vperm.xlu0 %1254, %v536_v62  }
  0x72   :  { %1007 = vperm.xlu0 %1254, %v1004_v63  }
  0x81   :  { %v63_v2 = vpop.permute.xlu1 %62  ;;  %v53_v3 = vpop.permute.xlu0 %52 }
  0x85   :  { %v68_v4 = vpop.permute.xlu1 %67  ;;  %v58_v5 = vpop.permute.xlu0 %57 }
  0x89   :  { %v78_v9 = vpop.permute.xlu1 %77  ;;  %v73_v13 = vpop.permute.xlu0 %72 }
  0x8d   :  { %v88_v20 = vpop.permute.xlu1 %87  ;;  %v83_v22 = vpop.permute.xlu0 %82 }
  0x91   :  { %v240_v42 = vpop.permute.xlu1 %239  ;;  %v235_v43 = vpop.permute.xlu0 %234 }
  0x95   :  { %v250_v44 = vpop.permute.xlu1 %249  ;;  %v245_v45 = vpop.permute.xlu0 %244 }
  0x99   :  { %v260_v46 = vpop.permute.xlu1 %259  ;;  %v255_v47 = vpop.permute.xlu0 %254 }
  0x9d   :  { %v270_v49 = vpop.permute.xlu1 %269  ;;  %v265_v51 = vpop.permute.xlu0 %264 }
  0xa1   :  { %v280_v60 = vpop.permute.xlu1 %279  ;;  %v275_v61 = vpop.permute.xlu0 %274 }
  0xda   :  { %v1174_v6 = vpop.f32.mrb[0].mxu1 }
  0xdb   :  { %v161_v7 = vpop.f32.mrb[1].mxu1  ;;  %v170_v10 = vadd.f32 %v1174_v6, %v63_v2 }
  0xdc   :  { %v1175_v8 = vpop.f32.mrb[2].mxu1  ;;  %v162_v14 = vadd.f32 %v161_v7, %v53_v3 }
  0xdd   :  { %v173_v11 = vadd.f32 %v1175_v8, %v68_v4  ;;  %v164_v12 = vpop.f32.mrb[3].mxu1 }
  0xde   :  { %v165_v15 = vadd.f32 %v164_v12, %v58_v5 }
  0xdf   :  { %v193_v16 = vpack.c.bf16 %v173_v11, %v170_v10  ;;  %v285_v11 = vpop.permute.xlu0 %284 }
  0xe0   :  { %v192_v17 = vpack.c.bf16 %v165_v15, %v162_v14 }
  0xe1   :  { %v197_v24 = vmax.bf16 %v1284_v0, %v193_v16 }
  0xe2   :  { %v1178_v18 = vpop.f32.mrb[4].mxu1  ;;  %v196_v19 = vmax.bf16 %v1284_v0, %v192_v17 }
  0xe3   :  { %v177_v21 = vpop.f32.mrb[5].mxu1  ;;  %v186_v25 = vadd.f32 %v1178_v18, %v83_v22  ;;  %v295_v22 = vpop.permute.xlu0 %294 }
  0xe4   :  { %v1179_v23 = vpop.f32.mrb[6].mxu1  ;;  %1180 = vmatprep.subr.bf16.mxu1 %v196_v19  ;;  %v178_v28 = vadd.f32 %v177_v21, %v73_v13 }
  0xe5   :  { %v189_v26 = vadd.f32 %v1179_v23, %v88_v20  ;;  %v180_v27 = vpop.f32.mrb[7].mxu1  ;;  %1181 = vmatpush3.bf16.msra.mxu1 %v196_v19 }
  0xe6   :  { %v181_v29 = vadd.f32 %v180_v27, %v78_v9  ;;  %1182 = vmatprep.subr.bf16.mxu1 %v197_v24  ;;  %v290_v9 = vpop.permute.xlu1 %289 }
  0xe7   :  { %v195_v30 = vpack.c.bf16 %v189_v26, %v186_v25 }
  0xe8   :  { %v194_v31 = vpack.c.bf16 %v181_v29, %v178_v28 }
  0xe9   :  { %1183 = vmatpush3.bf16.msra.mxu1 %v197_v24  ;;  %v199_v33 = vmax.bf16 %v1284_v0, %v195_v30 }
  0xea   :  { %v198_v32 = vmax.bf16 %v1284_v0, %v194_v31  ;;  %v300_v18 = vpop.permute.xlu1 %299  ;;  %v305_v31 = vpop.permute.xlu0 %304 }
  0xec   :  { %1184 = vmatprep.subr.bf16.mxu1 %v198_v32 }
  0xed   :  { %1185 = vmatpush3.bf16.msra.mxu1 %v198_v32 }
  0xee   :  { %1186 = vmatprep.subr.bf16.mxu1 %v199_v33  ;;  %v310_v29 = vpop.permute.xlu1 %309 }
  0xf1   :  { %1187 = vmatpush3.bf16.msra.mxu1 %v199_v33 }
  0xf4   :  { %1189 = vmatmul.mubr.msk.bf16.vlgmr.msra.gmra.mrb[8].mxu1 %vm352_vm2, %v1261_v34 }
  0xf5   :  { %1192 = vmatprep.mubr.msk.bf16.mxu1 %vm352_vm2, %v1262_v35 }
  0xfc   :  { %1193 = vmatmul.mubr.msk.bf16.gmra.mrb[12].mxu1 %vm352_vm2, %v1263_v36 }
  0xfd   :  { %1196 = vmatprep.mubr.msk.bf16.mxu1 %vm352_vm2, %v1264_v37 }
 0x104   :  { %1197 = vmatmul.mubr.msk.bf16.gmra.mrb[16].mxu1 %vm352_vm2, %v1265_v38 }
 0x105   :  { %1200 = vmatprep.mubr.msk.bf16.mxu1 %vm352_vm2, %v1266_v39 }
 0x10c   :  { %1201 = vmatmul.mubr.msk.bf16.gmra.mrb[20].mxu1 %vm352_vm2, %v1267_v40 }
 0x1c7   :  { %v1190_v48 = vpop.f32.mrb[8].mxu1 }
 0x1c8   :  { %v411_v50 = vpop.f32.mrb[9].mxu1  ;;  %v420_v53 = vadd.f32 %v1190_v48, %v245_v45  ;;  %v1271_v45 = vld [vmem:[%s1752_s5 + $0x18] sm:$0xff]   ;;  %v1274_v48 = vld [vmem:[%s1752_s5 + $0x30] sm:$0xff]  }
 0x1c9   :  { %v1191_v52 = vpop.f32.mrb[10].mxu1  ;;  %v412_v56 = vadd.f32 %v411_v50, %v235_v43  ;;  %v1269_v43 = vld [vmem:[%s1752_s5 + $0x8] sm:$0xff]   ;;  %v1276_v50 = vld [vmem:[%s1752_s5 + $0x40] sm:$0xff]  }
 0x1ca   :  { %v423_v54 = vadd.f32 %v1191_v52, %v250_v44  ;;  %v414_v55 = vpop.f32.mrb[11].mxu1  ;;  %v1270_v44 = vld [vmem:[%s1752_s5 + $0x10] sm:$0xff]  }
 0x1cb   :  { %v415_v57 = vadd.f32 %v414_v55, %v240_v42  ;;  %v1278_v52 = vld [vmem:[%s1752_s5 + $0x50] sm:$0xff]   ;;  %v1281_v55 = vld [vmem:[%s1752_s5 + $0x68] sm:$0xff]  }
 0x1cc   :  { %v475_v58 = vpack.c.bf16 %v423_v54, %v420_v53  ;;  %v1279_v53 = vld [vmem:[%s1752_s5 + $0x58] sm:$0xff]   ;;  %v1280_v54 = vld [vmem:[%s1752_s5 + $0x60] sm:$0xff]  }
 0x1cd   :  { %v474_v59 = vpack.c.bf16 %v415_v57, %v412_v56  ;;  %v1282_v56 = vld [vmem:[%s1752_s5 + $0x70] sm:$0xff]   ;;  %v1283_v57 = vld [vmem:[%s1752_s5 + $0x78] sm:$0xff]  }
 0x1ce   :  { %v483_v3 = vmax.bf16 %v1284_v0, %v475_v58  ;;  %v1619_v58 = vpop.permute.xlu1 %641 }
 0x1cf   :  { %v1194_v62 = vpop.f32.mrb[12].mxu1  ;;  %v482_v63 = vmax.bf16 %v1284_v0, %v474_v59  ;;  %v1621_v59 = vpop.permute.xlu0 %636 }
 0x1d0   :  { %v427_v1 = vpop.f32.mrb[13].mxu1  ;;  %v436_v4 = vadd.f32 %v1194_v62, %v265_v51  ;;  %v1277_v51 = vld [vmem:[%s1752_s5 + $0x48] sm:$0xff]   ;;  %v1626_v62 = vld.sshfl [vmem:[%s1753_s7] sm:$0x33 pattern:$0x76325410] }
 0x1d1   :  { %v1195_v2 = vpop.f32.mrb[14].mxu1  ;;  %1204 = vmatprep.subr.bf16.mxu0 %v482_v63  ;;  %v428_v7 = vadd.f32 %v427_v1, %v255_v47  ;;  %v1273_v47 = vld [vmem:[%s1752_s5 + $0x28] sm:$0xff]  }
 0x1d2   :  { %v439_v5 = vadd.f32 %v1195_v2, %v270_v49  ;;  %v430_v6 = vpop.f32.mrb[15].mxu1  ;;  %1205 = vmatpush3.bf16.msra.mxu0 %v482_v63  ;;  %v1275_v49 = vld [vmem:[%s1752_s5 + $0x38] sm:$0xff]   ;;  %v1018_v63 = vcombine.high %v1626_v62, %v1626_v62 }
 0x1d3   :  { %v431_v8 = vadd.f32 %v430_v6, %v260_v46  ;;  %1206 = vmatprep.subr.bf16.mxu0 %v483_v3  ;;  %v1272_v46 = vld [vmem:[%s1752_s5 + $0x20] sm:$0xff]  }
 0x1d4   :  { %v477_v10 = vpack.c.bf16 %v439_v5, %v436_v4  ;;  %1053 = vmatprep.mubr.bf16.mxu1 %v1018_v63 }
 0x1d5   :  { %v476_v12 = vpack.c.bf16 %v431_v8, %v428_v7 }
 0x1d6   :  { %1207 = vmatpush3.bf16.msra.mxu0 %v483_v3  ;;  %v485_v17 = vmax.bf16 %v1284_v0, %v477_v10 }
 0x1d7   :  { %v1198_v13 = vpop.f32.mrb[16].mxu1  ;;  %v484_v14 = vmax.bf16 %v1284_v0, %v476_v12 }
 0x1d8   :  { %v443_v15 = vpop.f32.mrb[17].mxu1  ;;  %v452_v19 = vadd.f32 %v1198_v13, %v285_v11 }
 0x1d9   :  { %v1199_v16 = vpop.f32.mrb[18].mxu1  ;;  %1208 = vmatprep.subr.bf16.mxu0 %v484_v14  ;;  %v444_v23 = vadd.f32 %v443_v15, %v275_v61  ;;  %v557_v61 = vpop.permute.xlu0 %556 }
 0x1da   :  { %v455_v20 = vadd.f32 %v1199_v16, %v290_v9  ;;  %v446_v21 = vpop.f32.mrb[19].mxu1  ;;  %1209 = vmatpush3.bf16.msra.mxu0 %v484_v14 }
 0x1db   :  { %v447_v24 = vadd.f32 %v446_v21, %v280_v60  ;;  %1210 = vmatprep.subr.bf16.mxu0 %v485_v17  ;;  %v562_v60 = vpop.permute.xlu1 %561 }
 0x1dc   :  { %v479_v25 = vpack.c.bf16 %v455_v20, %v452_v19 }
 0x1dd   :  { %v478_v26 = vpack.c.bf16 %v447_v24, %v444_v23  ;;  %v1632_v2 = vpop.permute.xlu0 %646 }
 0x1de   :  { %1211 = vmatpush3.bf16.msra.mxu0 %v485_v17  ;;  %v487_v33 = vmax.bf16 %v1284_v0, %v479_v25 }
 0x1df   :  { %v1202_v27 = vpop.f32.mrb[20].mxu1  ;;  %v486_v28 = vmax.bf16 %v1284_v0, %v478_v26  ;;  %v1630_v1 = vpop.permute.xlu1 %651 }
 0x1e0   :  { %v459_v30 = vpop.f32.mrb[21].mxu1  ;;  %v468_v34 = vadd.f32 %v1202_v27, %v305_v31 }
 0x1e1   :  { %v1203_v32 = vpop.f32.mrb[22].mxu1  ;;  %1212 = vmatprep.subr.bf16.mxu0 %v486_v28  ;;  %v460_v37 = vadd.f32 %v459_v30, %v295_v22  ;;  %v567_v4 = vpop.permute.xlu0 %566 }
 0x1e2   :  { %v471_v35 = vadd.f32 %v1203_v32, %v310_v29  ;;  %v462_v36 = vpop.f32.mrb[23].mxu1  ;;  %1213 = vmatpush3.bf16.msra.mxu0 %v486_v28 }
 0x1e3   :  { %v463_v38 = vadd.f32 %v462_v36, %v300_v18  ;;  %1214 = vmatprep.subr.bf16.mxu0 %v487_v33  ;;  %v572_v3 = vpop.permute.xlu1 %571 }
 0x1e4   :  { %v481_v39 = vpack.c.bf16 %v471_v35, %v468_v34 }
 0x1e5   :  { %v480_v40 = vpack.c.bf16 %v463_v38, %v460_v37  ;;  %v1636_v6 = vpop.permute.xlu0 %656 }
 0x1e6   :  { %1215 = vmatpush3.bf16.msra.mxu0 %v487_v33  ;;  %v489_v42 = vmax.bf16 %v1284_v0, %v481_v39 }
 0x1e7   :  { %v488_v41 = vmax.bf16 %v1284_v0, %v480_v40  ;;  %v1634_v5 = vpop.permute.xlu1 %661 }
 0x1e9   :  { %1216 = vmatprep.subr.bf16.mxu0 %v488_v41  ;;  %v577_v8 = vpop.permute.xlu0 %576 }
 0x1ea   :  { %1217 = vmatpush3.bf16.msra.mxu0 %v488_v41 }
 0x1eb   :  { %1218 = vmatprep.subr.bf16.mxu0 %v489_v42  ;;  %v582_v7 = vpop.permute.xlu1 %581 }
 0x1ed   :  { %v1640_v10 = vpop.permute.xlu0 %666 }
 0x1ee   :  { %1219 = vmatpush3.bf16.msra.mxu0 %v489_v42 }
 0x1ef   :  { %v1638_v9 = vpop.permute.xlu1 %671 }
 0x1f1   :  { %1221 = vmatmul.mubr.bf16.vlgmr.msra.gmra.mrb[0].mxu0 %v1269_v43  ;;  %v587_v12 = vpop.permute.xlu0 %586 }
 0x1f2   :  { %1224 = vmatprep.mubr.bf16.mxu0 %v1270_v44 }
 0x1f3   :  { %v592_v11 = vpop.permute.xlu1 %591 }
 0x1f5   :  { %v1644_v14 = vpop.permute.xlu0 %676 }
 0x1f7   :  { %v1642_v13 = vpop.permute.xlu1 %681 }
 0x1f9   :  { %1225 = vmatmul.mubr.bf16.gmra.mrb[4].mxu0 %v1271_v45  ;;  %v597_v16 = vpop.permute.xlu0 %596 }
 0x1fa   :  { %1228 = vmatprep.mubr.bf16.mxu0 %v1272_v46 }
 0x1fb   :  { %v602_v15 = vpop.permute.xlu1 %601 }
 0x1fd   :  { %v1648_v18 = vpop.permute.xlu0 %686 }
 0x1ff   :  { %v1646_v17 = vpop.permute.xlu1 %691 }
 0x201   :  { %1229 = vmatmul.mubr.bf16.gmra.mrb[8].mxu0 %v1273_v47  ;;  %v607_v22 = vpop.permute.xlu0 %606 }
 0x202   :  { %1232 = vmatprep.mubr.bf16.mxu0 %v1274_v48 }
 0x203   :  { %v612_v20 = vpop.permute.xlu1 %611 }
 0x205   :  { %v1658_v32 = vpop.permute.xlu0 %696 }
 0x207   :  { %v1656_v31 = vpop.permute.xlu1 %701 }
 0x209   :  { %1233 = vmatmul.mubr.bf16.gmra.mrb[12].mxu0 %v1275_v49  ;;  %v617_v43 = vpop.permute.xlu0 %616 }
 0x20a   :  { %1236 = vmatprep.mubr.bf16.mxu0 %v1276_v50 }
 0x20b   :  { %v622_v41 = vpop.permute.xlu1 %621 }
 0x20f   :  { %v1666_v48 = vpop.permute.xlu1 %711 }
 0x211   :  { %1237 = vmatmul.mubr.bf16.gmra.mrb[16].mxu0 %v1277_v51 }
 0x212   :  { %1240 = vmatprep.mubr.bf16.mxu0 %v1278_v52  ;;  %v1672_v52 = vpop.permute.xlu0 %706 }
 0x216   :  { %v627_v63 = vpop.permute.xlu0 %626 }
 0x219   :  { %1241 = vmatmul.mubr.bf16.gmra.mrb[20].mxu0 %v1279_v53 }
 0x21a   :  { %1244 = vmatprep.mubr.bf16.mxu0 %v1280_v54 }
 0x221   :  { %1245 = vmatmul.mubr.bf16.gmra.mrb[24].mxu0 %v1281_v55 }
 0x222   :  { %1248 = vmatprep.mubr.bf16.mxu0 %v1282_v56 }
 0x229   :  { %1249 = vmatmul.mubr.bf16.gmra.mrb[28].mxu0 %v1283_v57 }
 0x2c4   :  { %v1222_v19 = vpop.f32.mrb[0].mxu0 }
 0x2c5   :  { %v844_v21 = vpop.f32.mrb[1].mxu0  ;;  %v1650_v24 = vadd.f32 %v1222_v19, %v567_v4 }
 0x2c6   :  { %v1223_v23 = vpop.f32.mrb[2].mxu0  ;;  %v845_v27 = vadd.f32 %v844_v21, %v557_v61 }
 0x2c7   :  { %v1652_v25 = vadd.f32 %v1223_v23, %v572_v3  ;;  %v847_v26 = vpop.f32.mrb[3].mxu0 }
 0x2c8   :  { %v848_v28 = vadd.f32 %v847_v26, %v562_v60  ;;  %v632_v60 = vpop.permute.xlu1 %631 }
 0x2c9   :  { %v972_v29 = vpack.c.bf16 %v1652_v25, %v1650_v24 }
 0x2ca   :  { %v971_v30 = vpack.c.bf16 %v848_v28, %v845_v27 }
 0x2cc   :  { %v1226_v33 = vpop.f32.mrb[4].mxu0 }
 0x2cd   :  { %v860_v34 = vpop.f32.mrb[5].mxu0  ;;  %v1660_v36 = vadd.f32 %v1226_v33, %v587_v12 }
 0x2ce   :  { %v1227_v35 = vpop.f32.mrb[6].mxu0  ;;  %v861_v39 = vadd.f32 %v860_v34, %v577_v8 }
 0x2cf   :  { %v1662_v37 = vadd.f32 %v1227_v35, %v592_v11  ;;  %v863_v38 = vpop.f32.mrb[7].mxu0 }
 0x2d0   :  { %v864_v40 = vadd.f32 %v863_v38, %v582_v7 }
 0x2d1   :  { %v974_v42 = vpack.c.bf16 %v1662_v37, %v1660_v36 }
 0x2d2   :  { %v973_v44 = vpack.c.bf16 %v864_v40, %v861_v39  ;;  %v987_v39 = vmax.bf16 %v1284_v0, %v971_v30  ;;  %v988_v30 = vmax.bf16 %v1284_v0, %v972_v29 }
 0x2d4   :  { %v1230_v45 = vpop.f32.mrb[8].mxu0 }
 0x2d5   :  { %v876_v46 = vpop.f32.mrb[9].mxu0  ;;  %v1668_v49 = vadd.f32 %v1230_v45, %v607_v22 }
 0x2d6   :  { %v1231_v47 = vpop.f32.mrb[10].mxu0  ;;  %v1674_v53 = vadd.f32 %v876_v46, %v597_v16 }
 0x2d7   :  { %v1670_v50 = vadd.f32 %v1231_v47, %v612_v20  ;;  %v879_v51 = vpop.f32.mrb[11].mxu0 }
 0x2d8   :  { %v1676_v54 = vadd.f32 %v879_v51, %v602_v15 }
 0x2d9   :  { %v976_v55 = vpack.c.bf16 %v1670_v50, %v1668_v49 }
 0x2da   :  { %v975_v56 = vpack.c.bf16 %v1676_v54, %v1674_v53 }
 0x2dc   :  { %v1234_v57 = vpop.f32.mrb[12].mxu0 }
 0x2dd   :  { %v892_v61 = vpop.f32.mrb[13].mxu0  ;;  %v1682_v4 = vadd.f32 %v1234_v57, %v627_v63 }
 0x2de   :  { %v1235_v3 = vpop.f32.mrb[14].mxu0  ;;  %v1686_v11 = vadd.f32 %v892_v61, %v617_v43 }
 0x2df   :  { %v1684_v7 = vadd.f32 %v1235_v3, %v632_v60  ;;  %v895_v8 = vpop.f32.mrb[15].mxu0 }
 0x2e0   :  { %v1688_v12 = vadd.f32 %v895_v8, %v622_v41 }
 0x2e1   :  { %v978_v15 = vpack.c.bf16 %v1684_v7, %v1682_v4 }
 0x2e2   :  { %v977_v16 = vpack.c.bf16 %v1688_v12, %v1686_v11  ;;  %v1008_v11 = vpop.permute.xlu0 %1007 }
 0x2e4   :  { %v1238_v19 = vpop.f32.mrb[16].mxu0 }
 0x2e5   :  { %v908_v20 = vpop.f32.mrb[17].mxu0  ;;  %v917_v22 = vadd.f32 %v1238_v19, %v1632_v2 }
 0x2e6   :  { %v1239_v21 = vpop.f32.mrb[18].mxu0  ;;  %v909_v27 = vadd.f32 %v908_v20, %v1621_v59 }
 0x2e7   :  { %v920_v23 = vadd.f32 %v1239_v21, %v1630_v1  ;;  %v911_v26 = vpop.f32.mrb[19].mxu0 }
 0x2e8   :  { %v912_v28 = vadd.f32 %v911_v26, %v1619_v58 }
 0x2e9   :  { %v980_v33 = vpack.c.bf16 %v920_v23, %v917_v22 }
 0x2ea   :  { %v979_v34 = vpack.c.bf16 %v912_v28, %v909_v27 }
 0x2eb   :  { %v996_v43 = vmax.bf16 %v1284_v0, %v980_v33 }
 0x2ec   :  { %v1242_v35 = vpop.f32.mrb[20].mxu0  ;;  %v995_v38 = vmax.bf16 %v1284_v0, %v979_v34 }
 0x2ed   :  { %v924_v40 = vpop.f32.mrb[21].mxu0  ;;  %v933_v2 = vadd.f32 %v1242_v35, %v1640_v10 }
 0x2ee   :  { %v1243_v41 = vpop.f32.mrb[22].mxu0  ;;  %1148 = vmatprep.subr.bf16.mxu1 %v995_v38  ;;  %v925_v58 = vadd.f32 %v924_v40, %v1636_v6 }
 0x2ef   :  { %v936_v1 = vadd.f32 %v1243_v41, %v1638_v9  ;;  %v927_v45 = vpop.f32.mrb[23].mxu0  ;;  %1149 = vmatpush3.bf16.msra.mxu1 %v987_v39  ;;  %v989_v9 = vmax.bf16 %v1284_v0, %v973_v44  ;;  %v990_v44 = vmax.bf16 %v1284_v0, %v974_v42 }
 0x2f0   :  { %v928_v59 = vadd.f32 %v927_v45, %v1634_v5  ;;  %1150 = vmatprep.subr.bf16.mxu1 %v996_v43 }
 0x2f1   :  { %v982_v46 = vpack.c.bf16 %v936_v1, %v933_v2 }
 0x2f2   :  { %v981_v47 = vpack.c.bf16 %v928_v59, %v925_v58 }
 0x2f3   :  { %1151 = vmatpush3.bf16.msra.mxu1 %v988_v30  ;;  %v998_v6 = vmax.bf16 %v1284_v0, %v982_v46 }
 0x2f4   :  { %v1246_v51 = vpop.f32.mrb[24].mxu0  ;;  %v997_v10 = vmax.bf16 %v1284_v0, %v981_v47 }
 0x2f5   :  { %v940_v53 = vpop.f32.mrb[25].mxu0  ;;  %v949_v5 = vadd.f32 %v1246_v51, %v1648_v18 }
 0x2f6   :  { %v1247_v54 = vpop.f32.mrb[26].mxu0  ;;  %1152 = vmatprep.subr.bf16.mxu1 %v997_v10  ;;  %v941_v25 = vadd.f32 %v940_v53, %v1644_v14 }
 0x2f7   :  { %v952_v57 = vadd.f32 %v1247_v54, %v1646_v17  ;;  %v943_v24 = vpop.f32.mrb[27].mxu0  ;;  %1153 = vmatpush3.bf16.msra.mxu1 %v989_v9  ;;  %v991_v17 = vmax.bf16 %v1284_v0, %v975_v56  ;;  %v992_v56 = vmax.bf16 %v1284_v0, %v976_v55 }
 0x2f8   :  { %v944_v29 = vadd.f32 %v943_v24, %v1642_v13  ;;  %1154 = vmatprep.subr.bf16.mxu1 %v998_v6 }
 0x2f9   :  { %v984_v60 = vpack.c.bf16 %v952_v57, %v949_v5 }
 0x2fa   :  { %v983_v61 = vpack.c.bf16 %v944_v29, %v941_v25 }
 0x2fb   :  { %1155 = vmatpush3.bf16.msra.mxu1 %v990_v44  ;;  %v1000_v14 = vmax.bf16 %v1284_v0, %v984_v60 }
 0x2fc   :  { %v1250_v63 = vpop.f32.mrb[28].mxu0  ;;  %v999_v18 = vmax.bf16 %v1284_v0, %v983_v61 }
 0x2fd   :  { %v956_v3 = vpop.f32.mrb[29].mxu0  ;;  %v965_v13 = vadd.f32 %v1250_v63, %v1672_v52 }
 0x2fe   :  { %v1251_v8 = vpop.f32.mrb[30].mxu0  ;;  %1156 = vmatprep.subr.bf16.mxu1 %v999_v18  ;;  %v957_v37 = vadd.f32 %v956_v3, %v1658_v32 }
 0x2ff   :  { %v968_v19 = vadd.f32 %v1251_v8, %v1666_v48  ;;  %v959_v36 = vpop.f32.mrb[31].mxu0  ;;  %1157 = vmatpush3.bf16.msra.mxu1 %v991_v17  ;;  %v993_v48 = vmax.bf16 %v1284_v0, %v977_v16 }
 0x300   :  { %v960_v42 = vadd.f32 %v959_v36, %v1656_v31  ;;  %1158 = vmatprep.subr.bf16.mxu1 %v1000_v14  ;;  %v994_v31 = vmax.bf16 %v1284_v0, %v978_v15 }
 0x301   :  { %v986_v20 = vpack.c.bf16 %v968_v19, %v965_v13 }
 0x302   :  { %v985_v21 = vpack.c.bf16 %v960_v42, %v957_v37 }
 0x303   :  { %1159 = vmatpush3.bf16.msra.mxu1 %v992_v56  ;;  %v1002_v32 = vmax.bf16 %v1284_v0, %v986_v20 }
 0x304   :  { %v1001_v22 = vmax.bf16 %v1284_v0, %v985_v21 }
 0x306   :  { %1160 = vmatprep.subr.bf16.mxu1 %v1001_v22 }
 0x307   :  { %1161 = vmatpush3.bf16.msra.mxu1 %v993_v48 }
 0x308   :  { %1162 = vmatprep.subr.bf16.mxu1 %v1002_v32 }
 0x30b   :  { %1163 = vmatpush3.bf16.msra.mxu1 %v994_v31 }
 0x30e   :  { %1054 = vmatmul.mubr.bf16.vlgmr.msra.gmra.mrb[24].mxu1 %v1626_v62 }
 0x3e1   :  { %v1164_v49 = vpop.f32.mrb[24].mxu1 }
 0x3e2   :  { %v1165_v50 = vpop.f32.mrb[25].mxu1 }
 0x3e3   :  { %v1166_v52 = vadd.f32 %v1165_v50, %v1164_v49  ;;  %v1167_v55 = vpop.f32.mrb[26].mxu1 }
 0x3e4   :  { %v1168_v12 = vpop.f32.mrb[27].mxu1 }
 0x3e5   :  { %v1056_v16 = vadd.f32 %v1166_v52, %v1008_v11 }
 0x3e7   :  { %1061 = vst [vmem:[%s1754_s9] sm:$0xf] %v1056_v16 }

</bundles_post_ra>
